<compile_context>
chip_gen: v6e
topology: v6e:2x2x1
jax: 0.10.0
libtpu: 0.0.40
codegen_flags: <defaults>
</compile_context>

<pallas_src>
import math
from functools import lru_cache

import jax
import jax.numpy as jnp
from jax.experimental import pallas as pl
from jax.experimental.pallas import tpu as pltpu


# --------------------------------------------------------------------------- #
# Table construction (matches the PyTorch __init__ exactly, then casts once).
# --------------------------------------------------------------------------- #
def make_positional_encoding(d_model: int, max_len: int = 5000,
                             dtype=jnp.float32) -> jnp.ndarray:
    """Build the pe buffer like the PyTorch __init__, directly in `dtype`.

    Building in the model dtype hoists the (1, max_len, D) convert out of the
    forward path entirely (the forward only ever touches S rows).
    """
    position = jnp.arange(0, max_len, dtype=jnp.float32)[:, None]          # (max_len, 1)
    div_term = jnp.exp(
        jnp.arange(0, d_model, 2, dtype=jnp.float32) * (-math.log(10000.0) / d_model)
    )                                                                       # (d_model//2,)
    pe = jnp.zeros((max_len, d_model), dtype=jnp.float32)
    pe = pe.at[:, 0::2].set(jnp.sin(position * div_term))
    pe = pe.at[:, 1::2].set(jnp.cos(position * div_term))
    return pe[None, :, :].astype(dtype)                                     # (1, max_len, d_model)


# --------------------------------------------------------------------------- #
# Kernel body (rank-agnostic broadcast add: pe broadcasts over the batch axis).
# --------------------------------------------------------------------------- #
def _pe_add_kernel(x_ref, pe_ref, o_ref):
    o_ref[...] = x_ref[...] + pe_ref[...]


# --------------------------------------------------------------------------- #
# Generation-aware configuration.
# --------------------------------------------------------------------------- #
def _round_up(n: int, m: int) -> int:
    return ((n + m - 1) // m) * m


def _cdiv(a: int, b: int) -> int:
    return (a + b - 1) // b


# budget  : total bytes for all double-buffered blocks (x + pe + out).
# row_cap : max rows per tile (amortizes ~0.35us per-grid-step overhead).
# vmem_limit : explicit scoped-VMEM limit (headroom for Mosaic internal scratch).
# min_tiles  : force at least this many grid tiles (v7x: 2 TensorCores).
_GEN_CONFIG = {
    "v5e":     dict(budget=10 << 20, row_cap=512,  vmem_limit=20 << 20, min_tiles=1),
    "v6e":     dict(budget=26 << 20, row_cap=1024, vmem_limit=36 << 20, min_tiles=1),
    "v7x":     dict(budget=22 << 20, row_cap=1024, vmem_limit=30 << 20, min_tiles=2),
    "unknown": dict(budget=10 << 20, row_cap=512,  vmem_limit=None,     min_tiles=1),
}


@lru_cache(maxsize=1)
def _tpu_config():
    try:
        kind = jax.devices()[0].device_kind.lower()
    except Exception:  # no backend / interpret mode
        kind = ""
    if "v7" in kind or "7x" in kind:
        return _GEN_CONFIG["v7x"]
    if "v6" in kind:
        return _GEN_CONFIG["v6e"]
    if "v5e" in kind or "v5 lite" in kind or "v5lite" in kind:
        return _GEN_CONFIG["v5e"]
    return _GEN_CONFIG["unknown"]


def _pick_tiles_3d(B: int, R: int, C: int, itemsize: int,
                   budget: int, row_cap: int, min_tiles: int):
    """Choose (TB, TS) s.t. 2 * TS * (2*TB + 1) * C * itemsize <= budget."""
    sub = max(8, 32 // max(1, itemsize))          # packed sublane: 8 f32, 16 bf16, 32 int8/fp8
    row_bytes = C * itemsize
    budget_rows = max(3 * sub, budget // (2 * row_bytes))      # = TS * (2*TB + 1)
    ts_cap = min(row_cap, max(sub, ((budget_rows // 3) // sub) * sub))
    TS = min(_round_up(R, sub), ts_cap)
    TB = max(1, min(B, (budget_rows // TS - 1) // 2))
    # v7x: make sure both TensorCores get tiles on a purely DMA-bound kernel.
    if min_tiles > 1 and _cdiv(R, TS) * _cdiv(B, TB) < min_tiles:
        if B >= min_tiles:
            TB = _cdiv(B, min_tiles)
        elif R > sub:
            TS = max(sub, _round_up(_cdiv(R, min_tiles), sub))
    return TB, TS


# --------------------------------------------------------------------------- #
# pallas_call wrappers.
# --------------------------------------------------------------------------- #
def _pe_add_3d(x3: jnp.ndarray, pe3: jnp.ndarray, cfg, donate_x: bool) -> jnp.ndarray:
    """x3: (B, R, C) activations; pe3: (1, R_pe, C) table with R_pe >= R."""
    B, R, C = x3.shape
    itemsize = jnp.dtype(x3.dtype).itemsize
    TB, TS = _pick_tiles_3d(B, R, C, itemsize, cfg["budget"], cfg["row_cap"],
                            cfg["min_tiles"])
    grid = (_cdiv(R, TS), _cdiv(B, TB))   # (row tiles, batch tiles); batch innermost

    cost = pl.CostEstimate(flops=B * R * C, transcendentals=0,
                           bytes_accessed=(2 * B * R * C + R * C) * itemsize)
    return pl.pallas_call(
        _pe_add_kernel,
        out_shape=jax.ShapeDtypeStruct((B, R, C), x3.dtype),
        grid_spec=pl.GridSpec(
            grid=grid,
            in_specs=[
                # activations: new block every step
                pl.BlockSpec((TB, TS, C), lambda s, b: (b, s, 0)),
                # pe: block index constant along inner (batch) axis -> stays resident
                pl.BlockSpec((1, TS, C), lambda s, b: (0, s, 0)),
            ],
            out_specs=pl.BlockSpec((TB, TS, C), lambda s, b: (b, s, 0)),
        ),
        compiler_params=pltpu.CompilerParams(
            dimension_semantics=("parallel", "parallel"),
            vmem_limit_bytes=cfg["vmem_limit"],
        ),
        cost_estimate=cost,
        input_output_aliases=({0: 0} if donate_x else {}),
    )(x3, pe3)


def _pe_add_2d(x2: jnp.ndarray, pe2: jnp.ndarray, cfg, donate_x: bool) -> jnp.ndarray:
    """Ragged path. x2: (B, N) activations; pe2: (1, N) table slice (N = S*D)."""
    B, N = x2.shape
    itemsize = jnp.dtype(x2.dtype).itemsize
    budget = cfg["budget"]
    # Second-to-last block dim must be a multiple of 8 or the full batch extent.
    TB = B if B <= 8 else 8
    lane_cap = max(128, (budget // (2 * (2 * TB + 1) * itemsize)) // 128 * 128)
    TC = min(_round_up(N, 128), lane_cap)
    if cfg["min_tiles"] > 1 and _cdiv(N, TC) * _cdiv(B, TB) < cfg["min_tiles"] and N >= 256:
        TC = max(128, _round_up(_cdiv(N, cfg["min_tiles"]), 128))
    grid = (_cdiv(N, TC), _cdiv(B, TB))   # batch innermost -> pe tile stays resident

    cost = pl.CostEstimate(flops=B * N, transcendentals=0,
                           bytes_accessed=(2 * B * N + N) * itemsize)
    return pl.pallas_call(
        _pe_add_kernel,
        out_shape=jax.ShapeDtypeStruct((B, N), x2.dtype),
        grid_spec=pl.GridSpec(
            grid=grid,
            in_specs=[
                pl.BlockSpec((TB, TC), lambda c, b: (b, c)),
                pl.BlockSpec((1, TC), lambda c, b: (0, c)),
            ],
            out_specs=pl.BlockSpec((TB, TC), lambda c, b: (b, c)),
        ),
        compiler_params=pltpu.CompilerParams(
            dimension_semantics=("parallel", "parallel"),
            vmem_limit_bytes=cfg["vmem_limit"],
        ),
        cost_estimate=cost,
        input_output_aliases=({0: 0} if donate_x else {}),
    )(x2, pe2)


def positional_encoding_forward(x: jnp.ndarray, pe: jnp.ndarray, *,
                                donate_x: bool = False) -> jnp.ndarray:
    """y = x + pe[:, :S, :]  with x of shape (B, S, D).

    Pass a pe built with make_positional_encoding(..., dtype=x.dtype) so no
    full-table convert runs here.  donate_x=True aliases x's buffer to the output
    (use only when the caller does not reuse x).
    """
    B, S, D = x.shape
    _, max_len, d_model = pe.shape
    assert d_model == D, f"pe d_model {d_model} != x d_model {D}"
    assert S <= max_len, f"sequence length {S} exceeds positional table max_len {max_len}"

    if pe.dtype != x.dtype:
        # Fallback only (differs slightly from PyTorch's mixed-dtype promotion);
        # build the table in the model dtype to keep this off the hot path.
        pe = pe.astype(x.dtype)

    cfg = _tpu_config()

    if D % 128 == 0:
        # Already lane-dense; window the full table via BlockSpec (no copy).
        return _pe_add_3d(x, pe, cfg, donate_x)

    if (S * D) % 128 == 0:
        # Flatten (seq, d_model) to 128-lane rows: full-width vst stores.
        # Row-major reshapes are layout-preserving glue; pe only broadcasts over batch.
        C = 128
        x3 = x.reshape(B, (S * D) // C, C)
        if (max_len * D) % C == 0:
            pe3 = pe.reshape(1, (max_len * D) // C, C)        # full table, no copy
        else:
            pe3 = pe[:, :S, :].reshape(1, (S * D) // C, C)    # copies only the S used rows
        out = _pe_add_3d(x3, pe3, cfg, donate_x)
        return out.reshape(B, S, D)

    # Ragged S*D: 2-D rows with 128-multiple lane tiles; only the final partial vreg
    # per row is a masked store.  Avoids any padded copy of x.
    x2 = x.reshape(B, S * D)
    pe2 = pe[:, :S, :].reshape(1, S * D)                      # copies only the S used rows
    out = _pe_add_2d(x2, pe2, cfg, donate_x)
    return out.reshape(B, S, D)


if __name__ == "__main__":
    # Small shapes consistent with the module: batch=2, seq=8, d_model=32.
    B, S, D = 2, 8, 32
    MAX_LEN = 64

    key = jax.random.PRNGKey(0)
    x = jax.random.normal(key, (B, S, D), dtype=jnp.float32)

    # Table built once, directly in the model dtype (no per-call convert).
    pe = make_positional_encoding(D, MAX_LEN, dtype=x.dtype)

    y = positional_encoding_forward(x, pe)
    y = jax.block_until_ready(y)

    # Reference check against plain JAX (same semantics as the PyTorch forward).
    y_ref = x + pe[:, :S, :]
    assert y.shape == y_ref.shape and y.dtype == y_ref.dtype
    assert jnp.allclose(y, y_ref, atol=1e-6, rtol=1e-6), "mismatch vs reference"

    print("KERNEL_OK")
</pallas_src>

<mosaic_0001>
module attributes {stable_mosaic.version = 11 : i64} {
  func.func @_pe_add_kernel(%arg0: i32, %arg1: i32, %arg2: memref<2x8x128xf32, #tpu.memory_space<vmem>>, %arg3: memref<1x8x128xf32, #tpu.memory_space<vmem>>, %arg4: memref<2x8x128xf32, #tpu.memory_space<vmem>>) attributes {dimension_semantics = [#tpu.dimension_semantics<parallel>, #tpu.dimension_semantics<parallel>], iteration_bounds = array<i64: 1, 1>, scalar_prefetch = 0 : i64, scratch_operands = 0 : i64, tpu.core_type = #tpu.core_type<tc>, window_params = [{transform_indices = @transform_0, window_bounds = array<i64: 2, 8, 128>}, {transform_indices = @transform_1, window_bounds = array<i64: 1, 8, 128>}, {transform_indices = @transform_2, window_bounds = array<i64: 2, 8, 128>}]} {
    %c0 = arith.constant 0 : index
    %c0_0 = arith.constant 0 : index
    %c0_1 = arith.constant 0 : index
    %0 = vector.load %arg2[%c0, %c0_0, %c0_1] : memref<2x8x128xf32, #tpu.memory_space<vmem>>, vector<2x8x128xf32>
    %c0_2 = arith.constant 0 : index
    %c0_3 = arith.constant 0 : index
    %c0_4 = arith.constant 0 : index
    %1 = vector.load %arg3[%c0_2, %c0_3, %c0_4] : memref<1x8x128xf32, #tpu.memory_space<vmem>>, vector<1x8x128xf32>
    %2 = vector.broadcast %1 : vector<1x8x128xf32> to vector<2x8x128xf32>
    %3 = arith.addf %0, %2 : vector<2x8x128xf32>
    %c0_5 = arith.constant 0 : index
    %c0_6 = arith.constant 0 : index
    %c0_7 = arith.constant 0 : index
    %4 = vector.load %arg4[%c0_5, %c0_6, %c0_7] : memref<2x8x128xf32, #tpu.memory_space<vmem>>, vector<2x8x128xf32>
    tpu.vector_store %arg4[%c0_5, %c0_6, %c0_7], %3 {strides = array<i32>} : memref<2x8x128xf32, #tpu.memory_space<vmem>>, vector<2x8x128xf32>,
    return
  }
  func.func @transform_0(%arg0: i32, %arg1: i32) -> (i32, i32, i32) {
    %c0_i32 = arith.constant 0 : i32
    %c0_i32_0 = arith.constant 0 : i32
    return %arg1, %arg0, %c0_i32 : i32, i32, i32
  }
  func.func @transform_1(%arg0: i32, %arg1: i32) -> (i32, i32, i32) {
    %c0_i32 = arith.constant 0 : i32
    %c0_i32_0 = arith.constant 0 : i32
    %c0_i32_1 = arith.constant 0 : i32
    return %c0_i32, %arg0, %c0_i32_0 : i32, i32, i32
  }
  func.func @transform_2(%arg0: i32, %arg1: i32) -> (i32, i32, i32) {
    %c0_i32 = arith.constant 0 : i32
    %c0_i32_0 = arith.constant 0 : i32
    return %arg1, %arg0, %c0_i32 : i32, i32, i32
  }
}

</mosaic_0001>

<bundles_post_ra>
// kernel: tpu_custom_call.1
= control target key start
LH: loop header
LB: loop body
LE: loop exit
PB: predicated region body
PF: predicated region fallthrough
CT: control target
= control target key end

     0   :  { %7 = vsyncpa [#allocation3], 0  ;;  %s195_s0 = inlined_call_operand.hbm [shape: f32[2,2,128], index: 0, kind: input, shape index: {}]   ;;  %s196_s1 = inlined_call_operand.hbm [shape: f32[1,16,128], index: 1, kind: input, shape index: {}]   ;;  %s197_s2 = inlined_call_operand.hbm [shape: f32[2,2,128], index: 2, kind: output, shape index: {}]  }
   0x1   :  { %8 = vsyncpa [#allocation6], 0 }
   0x2   :  { %9 = vsyncpa [#allocation4], 0 }
   0x3   :  { %14 = vsyncadd [#allocation3], 192  ;;  %s19_s9 = sld [smem:[#allocation0]]   ;;  %s155_s10 = smov [#allocation2]  }
   0x4   :  { %s27_s11 = sshll.u32 %s155_s10, 4  ;;  %s156_s12 = smov 32   ;;  %s28_s11 = int_to_ptr.vmem [resolvable:$true] %s27_s11 }
   0x5   :  { %34 = sst [smem:[#allocation9]] %s156_s12  ;;  %s157_s13 = smov 128  }
   0x6   :  { %36 = sst [smem:[#allocation9 + $0x1]] %s157_s13  ;;  %s158_s14 = smov 1  }
   0x7   :  { %38 = sst [smem:[#allocation9 + $0x2]] %s158_s14  ;;  %s159_s17 = smov 2  }
   0x8   :  { %40 = sst [smem:[#allocation9 + $0x3]] %s156_s12  ;;  %s160_s18 = smov [#allocation3]  }
   0x9   :  { %s111_s15 = sshll.u32 %s19_s9, 26  ;;  %42 = sst [smem:[#allocation9 + $0x4]] %s156_s12 }
   0xa   :  { %s112_s16 = sadd.s32 134217728, %s111_s15  ;;  %44 = sst [smem:[#allocation9 + $0x5]] %s159_s17 }
   0xb   :  { %s161_s19 = smov 131072   ;;  %s162_s22 = smov [#allocation5]  }
   0xc   :  { %46 = dma.general %s195_s0, 64, %s28_s11, %s160_s18, %s161_s19, [#allocation9], %s112_s16, 0  }
   0xd   :  { %s53_s23 = sshll.u32 %s162_s22, 4  ;;  %s54_s23 = int_to_ptr.vmem [resolvable:$true] %s53_s23 }
   0xe   :  { %s137_s24 = scalar_lea.vmem %s54_s23, 128  ;;  %p142_p1 = scmp.lt.s32.totalorder %s54_s23, %s54_s23 }
   0xf   :  { %p138_p0 = scmp.ne.s32.totalorder %s54_s23, %s137_s24  ;;  %p143_p2 = scmp.lt.s32.totalorder %s137_s24, %s137_s24 }
  0x11   :  { %p144_p3 = por %p143_p2, %p142_p1 }
  0x13   :  { %p145_p4 = pnand %p144_p3, %p138_p0 }
  0x15   :  { %148 = shalt.err (!%p145_p4)
}
  0x16   :  { %56 = dma.hbm_to_vmem [thread:$0]  %s196_s1, 128, %s54_s23, [#allocation6]  }
  0x17   :  { %149 = dma.done.wait [#allocation3], 256  }
  0x18   :  { %150 = vsyncadd [#allocation3], 4294967040 }
  0x19   :  { %151 = dma.done.wait [#allocation6], 128  }
  0x1a   :  { %152 = vsyncadd [#allocation6], 4294967168  ;;  %v63_v0 = vld [vmem:[#allocation2] sm:$0xff]  ;;  %v65_v1 = vld [vmem:[#allocation5] sm:$0xff] }
  0x1b   :  { %v64_v2 = vld [vmem:[#allocation2 + $0x8] sm:$0xff]  ;;  %v66_v3 = vadd.f32 %v65_v1, %v63_v0 }
  0x1c   :  { %v67_v4 = vadd.f32 %v65_v1, %v64_v2 }
  0x1d   :  { %68 = vst [vmem:[#allocation7] sm:$0xff] %v66_v3 }
  0x1e   :  { %69 = vst [vmem:[#allocation7 + $0x8] sm:$0xff] %v67_v4 }
  0x1f   :  { %74 = vsyncadd [#allocation4], 192  ;;  %s163_s0 = smov [#allocation7]   ;;  %s164_s28 = smov 128  }
  0x20   :  { %s85_s27 = sshll.u32 %s163_s0, 4  ;;  %92 = sst [smem:[#allocation11]] %s164_s28  ;;  %s86_s27 = int_to_ptr.vmem [resolvable:$true] %s85_s27 }
  0x21   :  { %s165_s29 = smov 32   ;;  %s166_s1 = smov 1  }
  0x22   :  { %94 = sst [smem:[#allocation11 + $0x1]] %s165_s29  ;;  %s167_s30 = smov 2  }
  0x23   :  { %96 = sst [smem:[#allocation11 + $0x2]] %s166_s1  ;;  %s168_s3 = smov [#allocation4]  }
  0x24   :  { %98 = sst [smem:[#allocation11 + $0x3]] %s165_s29  ;;  %s169_s4 = smov 131072  }
  0x25   :  { %100 = sst [smem:[#allocation11 + $0x4]] %s165_s29  ;;  %s170_s5 = smov 0  }
  0x26   :  { %102 = sst [smem:[#allocation11 + $0x5]] %s167_s30 }
  0x27   :  { %104 = dma.general %s86_s27, 64, %s197_s2, %s168_s3, %s169_s4, [#allocation11], %s170_s5, 0  }
  0x28   :  { %153 = dma.done.wait [#allocation4], 256  }
  0x29   :  { %154 = vsyncadd [#allocation4], 4294967040 }
  0x2a   :  { %108 = vsyncpa [#allocation3], 1 }
  0x2b   :  { %109 = vsyncpa [#allocation6], 1 }
  0x2c   :  { %110 = vsyncpa [#allocation4], 1 }

</bundles_post_ra>
